<compile_context>
chip_gen: v5e
topology: v5e:2x2
jax: 0.10.0
libtpu: 0.0.40
codegen_flags: <defaults>
</compile_context>

<pallas_src>
import numpy as np
import jax
import jax.numpy as jnp
from jax.experimental import pallas as pl
from jax.experimental.pallas import tpu as pltpu


PACK = 128  # packed pooled-column width (>= sum(bin^2) = 50), one lane tile


# ----------------------------------------------------------------------------
# Pallas kernel: all PPM bins for block_n samples in a single grid step.
# ----------------------------------------------------------------------------
def ppm_fused_kernel(x_ref, poolT_ref, w_ref, bias_ref, mask_ref, upT_ref,
                     o_ref):
    """Shapes (per grid step, B = samples per step):
      x_ref    : (B, C, HW)      f32   input samples (spatial flattened)
      poolT_ref: (HW, PACK)      bf16  packed adaptive-avg-pool matrix
      w_ref    : (BR, C)         bf16  stacked BN-folded 1x1 conv weights
      bias_ref : (BR, PACK)      f32   BN-folded bias, broadcast over lanes
      mask_ref : (BR, PACK)      f32   1 where a column belongs to the row's bin
      upT_ref  : (PACK, HW)      bf16  packed bilinear upsample matrix
      o_ref    : (B, C+BR, HW)   f32   [x passthrough ; all bin branches]
    """
    B, C, _ = x_ref.shape
    poolT = poolT_ref[...]
    w = w_ref[...]
    bias = bias_ref[...]
    mask = mask_ref[...]
    upT = upT_ref[...]

    for b in range(B):                      # B is small & static -> unrolled
        x = x_ref[b]                                             # (C, HW) f32

        # Adaptive average pool for every bin at once, BEFORE the conv:
        # the contraction over HW shrinks the working set to PACK=128 lanes.
        xp = jnp.dot(x.astype(jnp.bfloat16), poolT,
                     preferred_element_type=jnp.float32)         # (C, PACK)

        # 1x1 conv (BN folded into W / bias) on the pooled columns.
        pooled = jnp.dot(w, xp.astype(jnp.bfloat16),
                         preferred_element_type=jnp.float32)     # (BR, PACK)

        # Bias + ReLU in f32, then zero columns belonging to other bins'
        # segments so the shared upsample matmul only contracts each row's
        # own bin segment.
        y = jnp.maximum(pooled + bias, 0.0) * mask

        # Bilinear upsample (align_corners=True) for every bin at once.
        up = jnp.dot(y.astype(jnp.bfloat16), upT,
                     preferred_element_type=jnp.float32)         # (BR, HW)

        # Fused output: exact f32 x passthrough, then all branch outputs.
        o_ref[b, :C, :] = x
        o_ref[b, C:, :] = up.astype(o_ref.dtype)


def _pick_block_n(n, max_block=8):
    """Samples per grid step: batch to amortize per-step pipeline overhead,
    but keep >=2 grid steps when possible so both v7x TensorCores get work."""
    divisors = [b for b in range(1, min(n, max_block) + 1) if n % b == 0]
    multi = [b for b in divisors if n // b >= 2]
    return max(multi) if multi else max(divisors)


def ppm_forward(x, params, block_n=None):
    """x: (N, C, H, W) float32 -> (N, C + num_bins*R, H, W) float32."""
    N, C, H, W = x.shape
    HW = H * W
    poolT, w_stacked, bias, mask, upT = params
    BR = w_stacked.shape[0]
    if block_n is None:
        block_n = _pick_block_n(N)
    assert N % block_n == 0, (N, block_n)
    x_flat = x.reshape(N, C, HW)

    out = pl.pallas_call(
        ppm_fused_kernel,
        out_shape=jax.ShapeDtypeStruct((N, C + BR, HW), jnp.float32),
        grid_spec=pltpu.PrefetchScalarGridSpec(
            num_scalar_prefetch=0,
            grid=(N // block_n,),
            in_specs=[
                pl.BlockSpec((block_n, C, HW), lambda n: (n, 0, 0)),
                pl.BlockSpec((HW, PACK), lambda n: (0, 0)),
                pl.BlockSpec((BR, C), lambda n: (0, 0)),
                pl.BlockSpec((BR, PACK), lambda n: (0, 0)),
                pl.BlockSpec((BR, PACK), lambda n: (0, 0)),
                pl.BlockSpec((PACK, HW), lambda n: (0, 0)),
            ],
            out_specs=pl.BlockSpec((block_n, C + BR, HW),
                                   lambda n: (n, 0, 0)),
        ),
        compiler_params=pltpu.CompilerParams(
            dimension_semantics=("parallel",)),
        # NOTE: at these toy sizes all blocks + constants sit far below the
        # scoped VMEM default; set vmem_limit_bytes here when retiling for
        # production-scale PPM.
    )(x_flat, poolT, w_stacked, bias, mask, upT)

    return out.reshape(N, C + BR, H, W)


# ----------------------------------------------------------------------------
# Constant matrices (adaptive pool / bilinear upsample), BN folding & packing.
# ----------------------------------------------------------------------------
def adaptive_pool_matrix(out_size, in_size):
    """(out_size, in_size) matrix implementing 1-D AdaptiveAvgPool."""
    P = np.zeros((out_size, in_size), dtype=np.float32)
    for i in range(out_size):
        start = (i * in_size) // out_size
        end = -(-((i + 1) * in_size) // out_size)  # ceil
        P[i, start:end] = 1.0 / (end - start)
    return P


def bilinear_up_matrix(out_size, in_size):
    """(out_size, in_size) matrix: 1-D linear interp, align_corners=True."""
    U = np.zeros((out_size, in_size), dtype=np.float32)
    if in_size == 1:
        U[:, 0] = 1.0
        return U
    for h in range(out_size):
        src = h * (in_size - 1) / (out_size - 1) if out_size > 1 else 0.0
        i0 = int(np.floor(src))
        i1 = min(i0 + 1, in_size - 1)
        w1 = src - i0
        U[h, i0] += 1.0 - w1
        U[h, i1] += w1
    return U


def make_ppm_params(key, in_dim, reduction_dim, bins, H, W, eps=1e-5):
    """Build packed per-bin parameters for the fused kernel + raw params
    (for the plain-JAX reference)."""
    HW = H * W
    BR = len(bins) * reduction_dim
    offsets = np.cumsum([0] + [b * b for b in bins])
    assert offsets[-1] <= PACK, "packed pooled columns exceed one lane tile"

    w_stacked = np.zeros((BR, in_dim), dtype=np.float32)
    bias = np.zeros((BR, PACK), dtype=np.float32)
    mask = np.zeros((BR, PACK), dtype=np.float32)
    poolT = np.zeros((HW, PACK), dtype=np.float32)
    upT = np.zeros((PACK, HW), dtype=np.float32)

    raw = []
    keys = jax.random.split(key, len(bins))
    for bi, (k, b) in enumerate(zip(keys, bins)):
        # Conv2d(in_dim, reduction_dim, 1, bias=False) weight -> (R, C)
        Wc = np.asarray(jax.random.normal(k, (reduction_dim, in_dim),
                                          jnp.float32)) * 0.1
        # BatchNorm2d(reduction_dim) parameters (inference semantics)
        gamma = 1.0 + 0.1 * np.arange(reduction_dim, dtype=np.float32)
        beta = 0.05 * np.arange(reduction_dim, dtype=np.float32)
        rmean = 0.01 * np.arange(reduction_dim, dtype=np.float32)
        rvar = 1.0 + 0.1 * np.arange(reduction_dim, dtype=np.float32)
        scale = gamma / np.sqrt(rvar + eps)
        w_fold = scale[:, None] * Wc                      # (R, C)
        b_fold = beta - scale * rmean                     # (R,)

        P_h = adaptive_pool_matrix(b, H)                  # (b, H)
        P_w = adaptive_pool_matrix(b, W)                  # (b, W)
        U_h = bilinear_up_matrix(H, b)                    # (H, b)
        U_w = bilinear_up_matrix(W, b)                    # (W, b)
        Pool = np.kron(P_h, P_w)                          # (b*b, HW)
        Up = np.kron(U_h, U_w)                            # (HW, b*b)

        r0, r1 = bi * reduction_dim, (bi + 1) * reduction_dim
        c0, c1 = int(offsets[bi]), int(offsets[bi + 1])
        w_stacked[r0:r1, :] = w_fold
        bias[r0:r1, :] = b_fold[:, None]
        mask[r0:r1, c0:c1] = 1.0
        poolT[:, c0:c1] = Pool.T
        upT[c0:c1, :] = Up.T

        raw.append((jnp.asarray(P_h), jnp.asarray(P_w), jnp.asarray(U_h),
                    jnp.asarray(U_w), jnp.asarray(Wc), jnp.asarray(gamma),
                    jnp.asarray(beta), jnp.asarray(rmean), jnp.asarray(rvar)))

    params = (jnp.asarray(poolT, dtype=jnp.bfloat16),
              jnp.asarray(w_stacked, dtype=jnp.bfloat16),
              jnp.asarray(bias),
              jnp.asarray(mask),
              jnp.asarray(upT, dtype=jnp.bfloat16))
    return params, raw


def ppm_reference(x, raw, eps=1e-5):
    """Plain-JAX reference of the PyTorch forward (BN in eval mode)."""
    outs = [x]
    for P_h, P_w, U_h, U_w, Wc, gamma, beta, rmean, rvar in raw:
        pooled = jnp.einsum('bh,nchw,dw->ncbd', P_h, x, P_w)
        y = jnp.einsum('rc,ncbd->nrbd', Wc, pooled)
        y = (y - rmean[None, :, None, None]) / jnp.sqrt(
            rvar[None, :, None, None] + eps)
        y = y * gamma[None, :, None, None] + beta[None, :, None, None]
        y = jnp.maximum(y, 0.0)
        up = jnp.einsum('hb,nrbd,wd->nrhw', U_h, y, U_w)
        outs.append(up)
    return jnp.concatenate(outs, axis=1)


if __name__ == "__main__":
    N, C, H, W = 4, 8, 16, 16
    bins = (1, 2, 3, 6)
    R = C // len(bins)  # reduction_dim = 2

    key = jax.random.PRNGKey(0)
    kx, kp = jax.random.split(key)
    x = jax.random.normal(kx, (N, C, H, W), jnp.float32)

    params, raw = make_ppm_params(kp, C, R, bins, H, W)

    fwd = jax.jit(lambda xx: ppm_forward(xx, params))
    out = jax.block_until_ready(fwd(x))

    assert out.shape == (N, C + len(bins) * R, H, W), out.shape

    ref = jax.block_until_ready(ppm_reference(x, raw))
    np.testing.assert_allclose(np.asarray(out), np.asarray(ref),
                               rtol=5e-2, atol=5e-2)

    print("KERNEL_OK")
</pallas_src>

<mosaic_0001>
module attributes {stable_mosaic.version = 11 : i64} {
  func.func @ppm_fused_kernel(%arg0: i32, %arg1: memref<2x8x256xf32, #tpu.memory_space<vmem>>, %arg2: memref<256x128xbf16, #tpu.memory_space<vmem>>, %arg3: memref<8x8xbf16, #tpu.memory_space<vmem>>, %arg4: memref<8x128xf32, #tpu.memory_space<vmem>>, %arg5: memref<8x128xf32, #tpu.memory_space<vmem>>, %arg6: memref<128x256xbf16, #tpu.memory_space<vmem>>, %arg7: memref<2x16x256xf32, #tpu.memory_space<vmem>>) attributes {dimension_semantics = [#tpu.dimension_semantics<parallel>], iteration_bounds = array<i64: 2>, scalar_prefetch = 0 : i64, scratch_operands = 0 : i64, tpu.core_type = #tpu.core_type<tc>, window_params = [{transform_indices = @transform_0, window_bounds = array<i64: 2, 8, 256>}, {pipeline_mode = #tpu.pipeline_mode<synchronous>, transform_indices = @transform_1, window_bounds = array<i64: 256, 128>}, {pipeline_mode = #tpu.pipeline_mode<synchronous>, transform_indices = @transform_2, window_bounds = array<i64: 8, 8>}, {pipeline_mode = #tpu.pipeline_mode<synchronous>, transform_indices = @transform_3, window_bounds = array<i64: 8, 128>}, {pipeline_mode = #tpu.pipeline_mode<synchronous>, transform_indices = @transform_4, window_bounds = array<i64: 8, 128>}, {pipeline_mode = #tpu.pipeline_mode<synchronous>, transform_indices = @transform_5, window_bounds = array<i64: 128, 256>}, {transform_indices = @transform_6, window_bounds = array<i64: 2, 16, 256>}]} {
    %c0 = arith.constant 0 : index
    %c0_0 = arith.constant 0 : index
    %0 = vector.load %arg2[%c0, %c0_0] : memref<256x128xbf16, #tpu.memory_space<vmem>>, vector<256x128xbf16>
    %c0_1 = arith.constant 0 : index
    %c0_2 = arith.constant 0 : index
    %1 = vector.load %arg3[%c0_1, %c0_2] : memref<8x8xbf16, #tpu.memory_space<vmem>>, vector<8x8xbf16>
    %c0_3 = arith.constant 0 : index
    %c0_4 = arith.constant 0 : index
    %2 = vector.load %arg4[%c0_3, %c0_4] : memref<8x128xf32, #tpu.memory_space<vmem>>, vector<8x128xf32>
    %c0_5 = arith.constant 0 : index
    %c0_6 = arith.constant 0 : index
    %3 = vector.load %arg5[%c0_5, %c0_6] : memref<8x128xf32, #tpu.memory_space<vmem>>, vector<8x128xf32>
    %c0_7 = arith.constant 0 : index
    %c0_8 = arith.constant 0 : index
    %4 = vector.load %arg6[%c0_7, %c0_8] : memref<128x256xbf16, #tpu.memory_space<vmem>>, vector<128x256xbf16>
    %c0_9 = arith.constant 0 : index
    %c0_10 = arith.constant 0 : index
    %c0_11 = arith.constant 0 : index
    %5 = vector.load %arg1[%c0_9, %c0_10, %c0_11] : memref<2x8x256xf32, #tpu.memory_space<vmem>>, vector<1x8x256xf32>
    %6 = vector.shape_cast %5 : vector<1x8x256xf32> to vector<8x256xf32>
    %7 = arith.truncf %6 : vector<8x256xf32> to vector<8x256xbf16>
    %cst = arith.constant dense<0.000000e+00> : vector<8x128xf32>
    %8 = tpu.matmul %7, %0, %cst {dimension_numbers = #tpu.dot_dimension_numbers<[1], [0], [0], [1], [0, 0, 1, 1], [], []>} : vector<8x256xbf16>, vector<256x128xbf16>, vector<8x128xf32> -> vector<8x128xf32>
    %9 = arith.truncf %8 : vector<8x128xf32> to vector<8x128xbf16>
    %cst_12 = arith.constant dense<0.000000e+00> : vector<8x128xf32>
    %10 = tpu.matmul %1, %9, %cst_12 {dimension_numbers = #tpu.dot_dimension_numbers<[1], [0], [0], [1], [0, 0, 1, 1], [], []>} : vector<8x8xbf16>, vector<8x128xbf16>, vector<8x128xf32> -> vector<8x128xf32>
    %11 = arith.addf %10, %2 : vector<8x128xf32>
    %cst_13 = arith.constant 0.000000e+00 : f32
    %12 = vector.broadcast %cst_13 : f32 to vector<8x128xf32>
    %13 = arith.maximumf %11, %12 : vector<8x128xf32>
    %14 = arith.mulf %13, %3 : vector<8x128xf32>
    %15 = arith.truncf %14 : vector<8x128xf32> to vector<8x128xbf16>
    %cst_14 = arith.constant dense<0.000000e+00> : vector<8x256xf32>
    %16 = tpu.matmul %15, %4, %cst_14 {dimension_numbers = #tpu.dot_dimension_numbers<[1], [0], [0], [1], [0, 0, 1, 1], [], []>} : vector<8x128xbf16>, vector<128x256xbf16>, vector<8x256xf32> -> vector<8x256xf32>
    %c0_15 = arith.constant 0 : index
    %c0_16 = arith.constant 0 : index
    %c0_17 = arith.constant 0 : index
    %17 = vector.load %arg7[%c0_15, %c0_16, %c0_17] : memref<2x16x256xf32, #tpu.memory_space<vmem>>, vector<1x8x256xf32>
    %18 = vector.shape_cast %17 : vector<1x8x256xf32> to vector<8x256xf32>
    %19 = vector.shape_cast %6 : vector<8x256xf32> to vector<1x8x256xf32>
    tpu.vector_store %arg7[%c0_15, %c0_16, %c0_17], %19 {strides = array<i32>} : memref<2x16x256xf32, #tpu.memory_space<vmem>>, vector<1x8x256xf32>,
    %c0_18 = arith.constant 0 : index
    %c8 = arith.constant 8 : index
    %c0_19 = arith.constant 0 : index
    %20 = vector.load %arg7[%c0_18, %c8, %c0_19] : memref<2x16x256xf32, #tpu.memory_space<vmem>>, vector<1x8x256xf32>
    %21 = vector.shape_cast %20 : vector<1x8x256xf32> to vector<8x256xf32>
    %22 = vector.shape_cast %16 : vector<8x256xf32> to vector<1x8x256xf32>
    tpu.vector_store %arg7[%c0_18, %c8, %c0_19], %22 {strides = array<i32>} : memref<2x16x256xf32, #tpu.memory_space<vmem>>, vector<1x8x256xf32>,
    %c1 = arith.constant 1 : index
    %c0_20 = arith.constant 0 : index
    %c0_21 = arith.constant 0 : index
    %23 = vector.load %arg1[%c1, %c0_20, %c0_21] : memref<2x8x256xf32, #tpu.memory_space<vmem>>, vector<1x8x256xf32>
    %24 = vector.shape_cast %23 : vector<1x8x256xf32> to vector<8x256xf32>
    %25 = arith.truncf %24 : vector<8x256xf32> to vector<8x256xbf16>
    %cst_22 = arith.constant dense<0.000000e+00> : vector<8x128xf32>
    %26 = tpu.matmul %25, %0, %cst_22 {dimension_numbers = #tpu.dot_dimension_numbers<[1], [0], [0], [1], [0, 0, 1, 1], [], []>} : vector<8x256xbf16>, vector<256x128xbf16>, vector<8x128xf32> -> vector<8x128xf32>
    %27 = arith.truncf %26 : vector<8x128xf32> to vector<8x128xbf16>
    %cst_23 = arith.constant dense<0.000000e+00> : vector<8x128xf32>
    %28 = tpu.matmul %1, %27, %cst_23 {dimension_numbers = #tpu.dot_dimension_numbers<[1], [0], [0], [1], [0, 0, 1, 1], [], []>} : vector<8x8xbf16>, vector<8x128xbf16>, vector<8x128xf32> -> vector<8x128xf32>
    %29 = arith.addf %28, %2 : vector<8x128xf32>
    %cst_24 = arith.constant 0.000000e+00 : f32
    %30 = vector.broadcast %cst_24 : f32 to vector<8x128xf32>
    %31 = arith.maximumf %29, %30 : vector<8x128xf32>
    %32 = arith.mulf %31, %3 : vector<8x128xf32>
    %33 = arith.truncf %32 : vector<8x128xf32> to vector<8x128xbf16>
    %cst_25 = arith.constant dense<0.000000e+00> : vector<8x256xf32>
    %34 = tpu.matmul %33, %4, %cst_25 {dimension_numbers = #tpu.dot_dimension_numbers<[1], [0], [0], [1], [0, 0, 1, 1], [], []>} : vector<8x128xbf16>, vector<128x256xbf16>, vector<8x256xf32> -> vector<8x256xf32>
    %c1_26 = arith.constant 1 : index
    %c0_27 = arith.constant 0 : index
    %c0_28 = arith.constant 0 : index
    %35 = vector.load %arg7[%c1_26, %c0_27, %c0_28] : memref<2x16x256xf32, #tpu.memory_space<vmem>>, vector<1x8x256xf32>
    %36 = vector.shape_cast %35 : vector<1x8x256xf32> to vector<8x256xf32>
    %37 = vector.shape_cast %24 : vector<8x256xf32> to vector<1x8x256xf32>
    tpu.vector_store %arg7[%c1_26, %c0_27, %c0_28], %37 {strides = array<i32>} : memref<2x16x256xf32, #tpu.memory_space<vmem>>, vector<1x8x256xf32>,
    %c1_29 = arith.constant 1 : index
    %c8_30 = arith.constant 8 : index
    %c0_31 = arith.constant 0 : index
    %38 = vector.load %arg7[%c1_29, %c8_30, %c0_31] : memref<2x16x256xf32, #tpu.memory_space<vmem>>, vector<1x8x256xf32>
    %39 = vector.shape_cast %38 : vector<1x8x256xf32> to vector<8x256xf32>
    %40 = vector.shape_cast %34 : vector<8x256xf32> to vector<1x8x256xf32>
    tpu.vector_store %arg7[%c1_29, %c8_30, %c0_31], %40 {strides = array<i32>} : memref<2x16x256xf32, #tpu.memory_space<vmem>>, vector<1x8x256xf32>,
    return
  }
  func.func @transform_0(%arg0: i32) -> (i32, i32, i32) {
    %c0_i32 = arith.constant 0 : i32
    %c0_i32_0 = arith.constant 0 : i32
    %c0_i32_1 = arith.constant 0 : i32
    return %arg0, %c0_i32, %c0_i32_0 : i32, i32, i32
  }
  func.func @transform_1(%arg0: i32) -> (i32, i32) {
    %c0_i32 = arith.constant 0 : i32
    %c0_i32_0 = arith.constant 0 : i32
    %c0_i32_1 = arith.constant 0 : i32
    return %c0_i32, %c0_i32_0 : i32, i32
  }
  func.func @transform_2(%arg0: i32) -> (i32, i32) {
    %c0_i32 = arith.constant 0 : i32
    %c0_i32_0 = arith.constant 0 : i32
    %c0_i32_1 = arith.constant 0 : i32
    return %c0_i32, %c0_i32_0 : i32, i32
  }
  func.func @transform_3(%arg0: i32) -> (i32, i32) {
    %c0_i32 = arith.constant 0 : i32
    %c0_i32_0 = arith.constant 0 : i32
    %c0_i32_1 = arith.constant 0 : i32
    return %c0_i32, %c0_i32_0 : i32, i32
  }
  func.func @transform_4(%arg0: i32) -> (i32, i32) {
    %c0_i32 = arith.constant 0 : i32
    %c0_i32_0 = arith.constant 0 : i32
    %c0_i32_1 = arith.constant 0 : i32
    return %c0_i32, %c0_i32_0 : i32, i32
  }
  func.func @transform_5(%arg0: i32) -> (i32, i32) {
    %c0_i32 = arith.constant 0 : i32
    %c0_i32_0 = arith.constant 0 : i32
    %c0_i32_1 = arith.constant 0 : i32
    return %c0_i32, %c0_i32_0 : i32, i32
  }
  func.func @transform_6(%arg0: i32) -> (i32, i32, i32) {
    %c0_i32 = arith.constant 0 : i32
    %c0_i32_0 = arith.constant 0 : i32
    %c0_i32_1 = arith.constant 0 : i32
    return %arg0, %c0_i32, %c0_i32_0 : i32, i32, i32
  }
}

</mosaic_0001>

<bundles_post_ra>
// kernel: _lambda_.1
= control target key start
LH: loop header
LB: loop body
LE: loop exit
PB: predicated region body
PF: predicated region fallthrough
CT: control target
= control target key end

     0   :  { %s947_s21 = smov 0   ;;  %s1169_s0 = inlined_call_operand.vmem [shape: f32[4,8,256], index: 0, kind: input, shape index: {}]   ;;  %s1170_s1 = inlined_call_operand.vmem [shape: bf16[256,128], index: 1, kind: input, shape index: {}]   ;;  %s1171_s2 = inlined_call_operand.vmem [shape: bf16[8,8], index: 2, kind: input, shape index: {}]   ;;  %s1172_s3 = inlined_call_operand.vmem [shape: f32[8,128], index: 3, kind: input, shape index: {}]   ;;  %s1173_s4 = inlined_call_operand.vmem [shape: f32[8,128], index: 4, kind: input, shape index: {}]   ;;  %s1174_s5 = inlined_call_operand.vmem [shape: bf16[128,256], index: 5, kind: input, shape index: {}]   ;;  %s1175_s6 = inlined_call_operand.vmem [shape: f32[4,16,256], index: 6, kind: output, shape index: {}]  }
   0x1 LB: > { %s713_s22 = sadd.s32 4294967295, %s910_s21   ;;  %p717_p0 = scmp.ge.s32.totalorder %s910_s21, 1  ;;  %s910_s21 = sphi %s947_s21, %s16_s21  }
   0x2   : > { %p214_p1 = scmp.lt.s32.totalorder %s910_s21, 3 }
   0x4   : > { %p215_p2 = pnand %p717_p0, %p214_p1 }
   0x5   : > { %s718_s27 = sshll.u32 (!%p215_p2), %s713_s22, 1 }
   0x6   : > { %218 = sbr.rel (%p215_p2) target bundleno = 614 (0x266), region = 44  ;;  %p247_p3 = scmp.lt.s32.totalorder (!%p215_p2), %s718_s27, 3 }
   0xb   : > { %v871_v0 = vld [vmem:[%s1170_s1 + $0x38] sm:$0xff]  ;;  %v870_v2 = vld [vmem:[%s1170_s1 + $0x30] sm:$0xff]  ;;  %s1177_s27 = smov (!%p247_p3, %s718_s27), 3  ;;  %v869_v4 = vld [vmem:[%s1170_s1 + $0x28] sm:$0xff]  ;;  %vm443_vm0 = vcmask 1043456   ;;  %vm439_vm1 = vcmask 64512  }
   0xc   : > { %v879_v1 = vld [vmem:[%s1170_s1 + $0x78] sm:$0xff]  ;;  %412 = vmatpush.bf16.msra.mxu0 %v871_v0  ;;  %v878_v3 = vld [vmem:[%s1170_s1 + $0x70] sm:$0xff]  ;;  %s862_s8 = sshll.u32 %s1177_s27, 4  ;;  %s863_s9 = sshll.u32 %s1177_s27, 5  ;;  %v877_v5 = vld [vmem:[%s1170_s1 + $0x68] sm:$0xff] }
   0xd   : > { %425 = vmatpush.bf16.msra.mxu1 %v879_v1  ;;  %s976_s16 = scalar_lea.vmem %s1169_s0, %s862_s8  ;;  %s981_s19 = scalar_lea.vmem %s1175_s6, %s863_s9  ;;  %v868_v8 = vld [vmem:[%s1170_s1 + $0x20] sm:$0xff]  ;;  %v867_v10 = vld [vmem:[%s1170_s1 + $0x18] sm:$0xff]  ;;  %v866_v12 = vld [vmem:[%s1170_s1 + $0x10] sm:$0xff] }
   0xe   : > { %v312_v6 = vld [vmem:[%s976_s16] sm:$0xff]  ;;  %v313_v7 = vld [vmem:[%s976_s16 + $0x8] sm:$0xff]  ;;  %v875_v11 = vld [vmem:[%s1170_s1 + $0x58] sm:$0xff] }
   0xf   : > { %569 = vst [vmem:[%s981_s19] sm:$0xff] %v312_v6  ;;  %v876_v9 = vld [vmem:[%s1170_s1 + $0x60] sm:$0xff]  ;;  %v874_v13 = vld [vmem:[%s1170_s1 + $0x50] sm:$0xff]  ;;  %v865_v14 = vld [vmem:[%s1170_s1 + $0x8] sm:$0xff]  ;;  %v314_v18 = vpack.c.bf16 %v312_v6, %v312_v6  ;;  %v315_v19 = vpack.c.bf16 %v313_v7, %v313_v7 }
  0x10   : > { %413 = vmatpush.bf16.msra.mxu0 %v870_v2  ;;  %570 = vst [vmem:[%s981_s19 + $0x8] sm:$0xff] %v313_v7  ;;  %v873_v15 = vld [vmem:[%s1170_s1 + $0x48] sm:$0xff]  ;;  %v864_v16 = vld [vmem:[%s1170_s1] sm:$0xff]  ;;  %v853_v20 = vld [vmem:[%s976_s16 + $0x10] sm:$0xff] }
  0x11   : > { %426 = vmatpush.bf16.msra.mxu1 %v878_v3  ;;  %v872_v17 = vld [vmem:[%s1170_s1 + $0x40] sm:$0xff]  ;;  %v854_v21 = vld [vmem:[%s976_s16 + $0x18] sm:$0xff]  ;;  %v847_v22 = vld [vmem:[%s1174_s5 + $0x70] sm:$0xf]  ;;  %v576_v23 = vpack.c.bf16 %v853_v20, %v853_v20  ;;  %856 = vst [vmem:[%s981_s19 + $0x20] sm:$0xff] %v853_v20 }
  0x12   : > { %v577_v24 = vpack.c.bf16 %v854_v21, %v854_v21  ;;  %v895_v25 = vld [vmem:[%s1174_s5 + $0x74] sm:$0xf0]  ;;  %857 = vst [vmem:[%s981_s19 + $0x28] sm:$0xff] %v854_v21  ;;  %v839_v27 = vld [vmem:[%s1174_s5 + $0x60] sm:$0xf] }
  0x13   : > { %v1027_v26 = vor.u32 %v895_v25, %v847_v22  ;;  %v893_v28 = vld [vmem:[%s1174_s5 + $0x64] sm:$0xf0]  ;;  %v831_v30 = vld [vmem:[%s1174_s5 + $0x50] sm:$0xf]  ;;  %v891_v31 = vld [vmem:[%s1174_s5 + $0x54] sm:$0xf0] }
  0x14   : > { %414 = vmatpush.bf16.msra.mxu0 %v869_v4  ;;  %v1036_v29 = vor.u32 %v893_v28, %v839_v27  ;;  %v1045_v32 = vor.u32 %v891_v31, %v831_v30  ;;  %v823_v33 = vld [vmem:[%s1174_s5 + $0x40] sm:$0xf]  ;;  %v889_v34 = vld [vmem:[%s1174_s5 + $0x44] sm:$0xf0]  ;;  %v815_v36 = vld [vmem:[%s1174_s5 + $0x30] sm:$0xf] }
  0x15   : > { %427 = vmatpush.bf16.msra.mxu1 %v877_v5  ;;  %543 = vmatpush.bf16.msra.mxu3 %v1027_v26  ;;  %v1054_v35 = vor.u32 %v889_v34, %v823_v33  ;;  %v887_v37 = vld [vmem:[%s1174_s5 + $0x34] sm:$0xf0]  ;;  %v894_v41 = vld [vmem:[%s1174_s5 + $0x74] sm:$0xf]  ;;  %v849_v42 = vld [vmem:[%s1174_s5 + $0x78] sm:$0xf0] }
  0x16   : > { %v1063_v38 = vor.u32 %v887_v37, %v815_v36  ;;  %v1072_v45 = vor.u32 %v894_v41, %v849_v42  ;;  %v892_v46 = vld [vmem:[%s1174_s5 + $0x64] sm:$0xf]  ;;  %v841_v47 = vld [vmem:[%s1174_s5 + $0x68] sm:$0xf0]  ;;  %v1084_v49 = vld [vmem:[%s1171_s2] sm:$0xf] }
  0x17   : > { %v1087_v50 = vor.u32 %v892_v46, %v841_v47  ;;  %v890_v53 = vld [vmem:[%s1174_s5 + $0x54] sm:$0xf]  ;;  %v833_v54 = vld [vmem:[%s1174_s5 + $0x58] sm:$0xf0]  ;;  %v888_v56 = vld [vmem:[%s1174_s5 + $0x44] sm:$0xf] }
  0x18   : > { %415 = vmatpush.bf16.msra.mxu0 %v868_v8  ;;  %v836_v55 = vor.u32 %v890_v53, %v833_v54  ;;  %v825_v57 = vld [vmem:[%s1174_s5 + $0x48] sm:$0xf0]  ;;  %v886_v59 = vld [vmem:[%s1174_s5 + $0x34] sm:$0xf]  ;;  %v817_v60 = vld [vmem:[%s1174_s5 + $0x38] sm:$0xf0] }
  0x19   : > { %428 = vmatpush.bf16.msra.mxu1 %v876_v9  ;;  %544 = vmatpush.bf16.msra.mxu3 %v1036_v29  ;;  %v828_v58 = vor.u32 %v888_v56, %v825_v57  ;;  %v820_v61 = vor.u32 %v886_v59, %v817_v60  ;;  %v807_v62 = vld [vmem:[%s1174_s5 + $0x20] sm:$0xf]  ;;  %v885_v63 = vld [vmem:[%s1174_s5 + $0x24] sm:$0xf0]  ;;  %v799_v6 = vld [vmem:[%s1174_s5 + $0x10] sm:$0xf] }
  0x1a   : > { %v883_v7 = vld [vmem:[%s1174_s5 + $0x14] sm:$0xf0] }
  0x1c   : > { %416 = vmatpush.bf16.msra.mxu0 %v867_v10 }
  0x1d   : > { %429 = vmatpush.bf16.msra.mxu1 %v875_v11  ;;  %545 = vmatpush.bf16.msra.mxu3 %v1045_v32 }
  0x20   : > { %417 = vmatpush.bf16.msra.mxu0 %v866_v12 }
  0x21   : > { %430 = vmatpush.bf16.msra.mxu1 %v874_v13  ;;  %546 = vmatpush.bf16.msra.mxu3 %v1054_v35 }
  0x24   : > { %418 = vmatpush.bf16.msra.mxu0 %v865_v14 }
  0x25   : > { %431 = vmatpush.bf16.msra.mxu1 %v873_v15  ;;  %547 = vmatpush.bf16.msra.mxu3 %v1063_v38 }
  0x28   : > { %419 = vmatpush.bf16.msra.mxu0 %v864_v16 }
  0x29   : > { %432 = vmatpush.bf16.msra.mxu1 %v872_v17 }
  0x2b   : > { %420 = vmatmul.bf16.vlgmr.msra.gmra.mxu0 %v314_v18 }
  0x2c   : > { %578 = vmatpush.bf16.msrb.mxu0 %v871_v0  ;;  %433 = vmatmul.bf16.vlgmr.msra.gmra.mxu1 %v315_v19  ;;  %v884_v0 = vld [vmem:[%s1174_s5 + $0x24] sm:$0xf] }
  0x2d   : > { %591 = vmatpush.bf16.msrb.mxu1 %v879_v1  ;;  %v808_v1 = vor.u32 %v885_v63, %v807_v62 }
  0x2f   : > { %548 = vmatpush.bf16.msra.mxu3 %v808_v1 }
  0x30   : > { %579 = vmatpush.bf16.msrb.mxu0 %v870_v2  ;;  %v809_v2 = vld [vmem:[%s1174_s5 + $0x28] sm:$0xf0] }
  0x31   : > { %592 = vmatpush.bf16.msrb.mxu1 %v878_v3  ;;  %v812_v3 = vor.u32 %v884_v0, %v809_v2 }
  0x34   : > { %580 = vmatpush.bf16.msrb.mxu0 %v869_v4 }
  0x35   : > { %593 = vmatpush.bf16.msrb.mxu1 %v877_v5 }
  0x38   : > { %581 = vmatpush.bf16.msrb.mxu0 %v868_v8  ;;  %v882_v8 = vld [vmem:[%s1174_s5 + $0x14] sm:$0xf] }
  0x39   : > { %594 = vmatpush.bf16.msrb.mxu1 %v876_v9  ;;  %v800_v9 = vor.u32 %v883_v7, %v799_v6 }
  0x3b   : > { %549 = vmatpush.bf16.msra.mxu3 %v800_v9 }
  0x3c   : > { %582 = vmatpush.bf16.msrb.mxu0 %v867_v10  ;;  %v801_v10 = vld [vmem:[%s1174_s5 + $0x18] sm:$0xf0] }
  0x3d   : > { %595 = vmatpush.bf16.msrb.mxu1 %v875_v11 }
  0x40   : > { %583 = vmatpush.bf16.msrb.mxu0 %v866_v12  ;;  %v804_v12 = vor.u32 %v882_v8, %v801_v10 }
  0x41   : > { %596 = vmatpush.bf16.msrb.mxu1 %v874_v13  ;;  %v791_v13 = vld [vmem:[%s1174_s5] sm:$0xf] }
  0x44   : > { %584 = vmatpush.bf16.msrb.mxu0 %v865_v14  ;;  %v881_v14 = vld [vmem:[%s1174_s5 + $0x4] sm:$0xf0] }
  0x45   : > { %597 = vmatpush.bf16.msrb.mxu1 %v873_v15  ;;  %v880_v15 = vld [vmem:[%s1174_s5 + $0x4] sm:$0xf] }
  0x48   : > { %585 = vmatpush.bf16.msrb.mxu0 %v864_v16  ;;  %v792_v16 = vor.u32 %v881_v14, %v791_v13 }
  0x49   : > { %598 = vmatpush.bf16.msrb.mxu1 %v872_v17  ;;  %v793_v17 = vld [vmem:[%s1174_s5 + $0x8] sm:$0xf0] }
  0x4a   : > { %v796_v21 = vor.u32 %v880_v15, %v793_v17  ;;  %550 = vmatpush.bf16.msra.mxu3 %v792_v16 }
  0x4b   : > { %586 = vmatmul.bf16.vlgmr.msrb.gmra.mxu0 %v576_v23  ;;  %v294_v23 = vld [vmem:[%s1172_s3] sm:$0xff] }
  0x4c   : > { %599 = vmatmul.bf16.vlgmr.msrb.gmra.mxu1 %v577_v24 }
  0xa8   : > { %v421_v39 = vpop.f32.mrf.mxu0 }
  0xa9   : > { %v434_v40 = vpop.f32.mrf.mxu1 }
  0xaa   : > { %v435_v43 = vadd.f32 %v434_v40, %v421_v39 }
  0xac   : > { %v438_v44 = vpack.c.bf16 %v435_v43, %v435_v43 }
  0xae   : > { %v445_v48 = vsel %vm443_vm0, %v438_v44, 0 }
  0xaf   : > { %454 = vmatpush.bf16.msra.mxu2 %v445_v48 }
  0xb0   : > { %v423_v51 = vpop.f32.mrf.mxu0 }
  0xb1   : > { %v436_v52 = vpop.f32.mrf.mxu1 }
  0xb2   : > { %788 = vmatmul.msk.bf16.vlgmr.msra.gmra.mxu2 %vm439_vm1, %v1084_v49 }
  0xb3   : > { %556 = vmatpush.bf16.msrb.mxu2 %v1072_v45 }
  0xb7   : > { %557 = vmatpush.bf16.msrb.mxu2 %v1087_v50 }
  0xbb   : > { %558 = vmatpush.bf16.msrb.mxu2 %v836_v55 }
  0xbf   : > { %559 = vmatpush.bf16.msrb.mxu2 %v828_v58 }
  0xc3   : > { %560 = vmatpush.bf16.msrb.mxu2 %v820_v61 }
  0xc7   : > { %561 = vmatpush.bf16.msrb.mxu2 %v812_v3 }
  0xc8   : > { %v587_v4 = vpop.f32.mrf.mxu0 }
  0xc9   : > { %v600_v5 = vpop.f32.mrf.mxu1 }
  0xca   : > { %v601_v11 = vadd.f32 %v600_v5, %v587_v4 }
  0xcb   : > { %562 = vmatpush.bf16.msrb.mxu2 %v804_v12 }
  0xcc   : > { %v604_v18 = vpack.c.bf16 %v601_v11, %v601_v11 }
  0xce   : > { %v606_v22 = vsel %vm443_vm0, %v604_v18, 0 }
  0xcf   : > { %563 = vmatpush.bf16.msrb.mxu2 %v796_v21  ;;  %615 = vmatpush.bf16.msrb.mxu3 %v606_v22 }
  0xd0   : > { %v589_v19 = vpop.f32.mrf.mxu0 }
  0xd1   : > { %v602_v20 = vpop.f32.mrf.mxu1 }
  0xd3   : > { %624 = vmatpush.bf16.msra.mxu2 %v1027_v26  ;;  %v295_v26 = vld [vmem:[%s1173_s4] sm:$0xff] }
  0xd7   : > { %625 = vmatpush.bf16.msra.mxu2 %v1036_v29 }
  0xdb   : > { %626 = vmatpush.bf16.msra.mxu2 %v1045_v32 }
  0xdf   : > { %627 = vmatpush.bf16.msra.mxu2 %v1054_v35 }
  0xe3   : > { %628 = vmatpush.bf16.msra.mxu2 %v1063_v38 }
  0xe7   : > { %629 = vmatpush.bf16.msra.mxu2 %v808_v1 }
  0xeb   : > { %630 = vmatpush.bf16.msra.mxu2 %v800_v9 }
  0xef   : > { %631 = vmatpush.bf16.msra.mxu2 %v792_v16 }
 0x135   : > { %v456_v24 = vpop.f32.mrf.mxu2 }
 0x136   : > { %v457_v25 = vadd.f32 %v456_v24, %v294_v23 }
 0x138   : > { %v460_v27 = vmax.f32 %v457_v25, 0.0 }
 0x13a   : > { %v461_v28 = vmul.f32 %v460_v27, %v295_v26 }
 0x13c   : > { %v462_v29 = vpack.c.bf16 %v461_v28, %v461_v28 }
 0x13d   : > { %v458_v30 = vpop.f32.mrf.mxu2 }
 0x13e   : > { %551 = vmatmul.bf16.vlgmr.msra.gmra.mxu3 %v462_v29  ;;  %564 = vmatmul.bf16.vlgmr.msrb.gmra.mxu2 %v462_v29 }
 0x13f   : > { %637 = vmatpush.bf16.msra.mxu3 %v1072_v45 }
 0x143   : > { %638 = vmatpush.bf16.msra.mxu3 %v1087_v50 }
 0x147   : > { %639 = vmatpush.bf16.msra.mxu3 %v836_v55 }
 0x14b   : > { %640 = vmatpush.bf16.msra.mxu3 %v828_v58 }
 0x14e   : > { %855 = vmatmul.msk.bf16.vlgmr.msrb.gmra.mxu3 %vm439_vm1, %v1084_v49 }
 0x14f   : > { %641 = vmatpush.bf16.msra.mxu3 %v820_v61 }
 0x153   : > { %642 = vmatpush.bf16.msra.mxu3 %v812_v3 }
 0x157   : > { %643 = vmatpush.bf16.msra.mxu3 %v804_v12 }
 0x15b   : > { %644 = vmatpush.bf16.msra.mxu3 %v796_v21 }
 0x1c1   : > { %v552_v31 = vpop.f32.mrf.mxu3  ;;  %v565_v32 = vpop.f32.mrf.mxu2 }
 0x1c2   : > { %571 = vst [vmem:[%s981_s19 + $0x10] sm:$0xff] %v552_v31 }
 0x1c3   : > { %572 = vst [vmem:[%s981_s19 + $0x18] sm:$0xff] %v565_v32 }
 0x1c9   : > { %v554_v33 = vpop.f32.mrf.mxu3  ;;  %v567_v34 = vpop.f32.mrf.mxu2 }
 0x1d1   : > { %v617_v35 = vpop.f32.mrf.mxu3 }
 0x1d2   : > { %v618_v36 = vadd.f32 %v617_v35, %v294_v23 }
 0x1d4   : > { %v621_v37 = vmax.f32 %v618_v36, 0.0 }
 0x1d6   : > { %v622_v38 = vmul.f32 %v621_v37, %v295_v26 }
 0x1d8   : > { %v623_v39 = vpack.c.bf16 %v622_v38, %v622_v38 }
 0x1d9   : > { %v619_v40 = vpop.f32.mrf.mxu3 }
 0x1da   : > { %632 = vmatmul.bf16.vlgmr.msra.gmra.mxu2 %v623_v39  ;;  %645 = vmatmul.bf16.vlgmr.msra.gmra.mxu3 %v623_v39 }
 0x25d   : > { %v633_v41 = vpop.f32.mrf.mxu2  ;;  %v646_v42 = vpop.f32.mrf.mxu3 }
 0x25e   : > { %858 = vst [vmem:[%s981_s19 + $0x30] sm:$0xff] %v633_v41 }
 0x25f   : > { %859 = vst [vmem:[%s981_s19 + $0x38] sm:$0xff] %v646_v42 }
 0x265   : > { %v635_v43 = vpop.f32.mrf.mxu2  ;;  %v648_v44 = vpop.f32.mrf.mxu3 }
 0x266 PF: > { %s16_s21 = sadd.s32 1, %s910_s21  }
 0x267   : > { %p13_p4 = scmp.ge.s32.totalorder %s16_s21, 4  }
 0x269   :  { %15 = sbr.rel (!%p13_p4) target bundleno = 1 (0x1), region = 76 }

</bundles_post_ra>
